<compile_context>
chip_gen: v5e
topology: v5e:2x2
jax: 0.10.0
libtpu: 0.0.40
codegen_flags: <defaults>
</compile_context>

<pallas_src>
import functools

import jax
import jax.numpy as jnp
from jax.experimental import pallas as pl
from jax.experimental.pallas import tpu as pltpu

_BN_EPS = 1e-5


def _round_up(x: int, m: int) -> int:
    return ((x + m - 1) // m) * m


# ---------------------------------------------------------------------------
# Pallas kernel: one row-tile of the duplicated MLP encoder.
#   x_ref  : (TN, F)            input attribute tile
#   w1_ref : (F, FE_pad)        kron(I_F, w1_eff) -- first layer + folded eval-BN
#   b1_ref : (1, FE_pad)        tiled first-layer bias (folded eval-BN), zero in pad
#   w2_ref : (FE_pad, FE_pad)   kron(I_F, W2^T), zero rows/cols in pad
#   b2_ref : (1, FE_pad)        tiled second-layer bias, zero in pad
#   o_ref  : (TN, FE_pad)       output tile (FE_pad = round_up(F*E, 128))
# ---------------------------------------------------------------------------
def _dup_mlp_kernel(x_ref, w1_ref, b1_ref, w2_ref, b2_ref, o_ref, *, n_feat):
    x = x_ref[...]                                   # (TN, F)
    w1 = w1_ref[...]                                 # (F, FE_pad)

    # Layer 1 (+ folded BatchNorm affine): F broadcast-multiply-adds on the VPU.
    # Blocks of w1 are disjoint per feature, so accumulation just places them.
    h = b1_ref[...] + x[:, 0:1] * w1[0:1, :]         # (TN, FE_pad)
    for f in range(1, n_feat):                       # static, F is tiny
        h = h + x[:, f:f + 1] * w1[f:f + 1, :]

    # GELU on the lane-dense activation (EUP tanh path).
    h = jax.nn.gelu(h, approximate=True)

    # Layer 2: ONE MXU matmul with the block-diagonal kron weight (K, N multiples of 128).
    y = jnp.dot(h, w2_ref[...], preferred_element_type=jnp.float32) + b2_ref[...]

    o_ref[...] = y.astype(o_ref.dtype)               # single lane-dense store


# ---------------------------------------------------------------------------
# One-time parameter preparation (hoisted out of the forward path).
# ---------------------------------------------------------------------------
def prepare_encoder_params(params, n_features: int):
    """Fold eval-mode BatchNorm into the first linear and build the block-diagonal
    (kron) weights used by the kernel. Returns kernel-ready arrays (all padded so the
    last dim is a multiple of 128)."""
    if params is None or n_features == 0:
        return None
    E = params["b1"].shape[0]
    F = n_features
    FE = F * E
    FE_pad = _round_up(FE, 128)
    pad = FE_pad - FE

    s = params["gamma"] * jax.lax.rsqrt(params["rvar"] + _BN_EPS)
    w1_eff = params["w1"].reshape(1, E) * s[None, :]                        # (1, E)
    b1_eff = params["b1"] * s + (params["beta"] - params["rmean"] * s)      # (E,)

    eye = jnp.eye(F, dtype=jnp.float32)
    w1_blk = jnp.kron(eye, w1_eff.astype(jnp.float32))                      # (F, FE)
    w2_blk = jnp.kron(eye, params["w2"].T.astype(jnp.float32))              # (FE, FE)
    b1_t = jnp.tile(b1_eff.astype(jnp.float32)[None, :], (1, F))            # (1, FE)
    b2_t = jnp.tile(params["b2"].astype(jnp.float32)[None, :], (1, F))      # (1, FE)

    return dict(
        w1=jnp.pad(w1_blk, ((0, 0), (0, pad))),
        b1=jnp.pad(b1_t, ((0, 0), (0, pad))),
        w2=jnp.pad(w2_blk, ((0, pad), (0, pad))),
        b2=jnp.pad(b2_t, ((0, 0), (0, pad))),
        n_valid=FE,      # python int (prep is closed over, never passed through jit)
    )


def _encode_one(x: jax.Array, prep: dict, tile_n: int = 1024) -> jax.Array:
    """Apply the shared MLP(1->E->E) to every column of x: [N, F] -> [N, F*E]."""
    N, F = x.shape
    FE_pad = prep["w2"].shape[0]
    FE = prep["n_valid"]
    dt = x.dtype

    # Row tiling: big tiles for large N, but aim for >=2 grid steps so the "parallel"
    # grid axis can shard rows across a megacore's two TensorCores.
    half = _round_up(max((N + 1) // 2, 1), 8)
    tn = max(8, min(tile_n, half))
    n_pad = _round_up(N, tn)
    grid = (n_pad // tn,)
    x_pad = jnp.pad(x, ((0, n_pad - N), (0, 0)))

    kern = functools.partial(_dup_mlp_kernel, n_feat=F)

    out = pl.pallas_call(
        kern,
        out_shape=jax.ShapeDtypeStruct((n_pad, FE_pad), dt),
        grid_spec=pltpu.PrefetchScalarGridSpec(
            num_scalar_prefetch=0,
            grid=grid,
            in_specs=[
                pl.BlockSpec((tn, F), lambda i: (i, 0)),
                pl.BlockSpec((F, FE_pad), lambda i: (0, 0)),
                pl.BlockSpec((1, FE_pad), lambda i: (0, 0)),
                pl.BlockSpec((FE_pad, FE_pad), lambda i: (0, 0)),
                pl.BlockSpec((1, FE_pad), lambda i: (0, 0)),
            ],
            out_specs=pl.BlockSpec((tn, FE_pad), lambda i: (i, 0)),
        ),
        compiler_params=pltpu.CompilerParams(dimension_semantics=("parallel",)),
    )(x_pad, prep["w1"], prep["b1"], prep["w2"], prep["b2"])
    return out[:N, :FE]


def make_duplicated_encoder_forward(node_prep, edge_prep, glob_prep, tile_n: int = 1024):
    """Build a jitted forward mirroring DuplicatedEncoder.forward (IdentityScaler).
    Parameter prep dicts are closed over (one-time cost, constants at trace time)."""

    def _go(attr, prep):
        if prep is None or attr.size == 0:   # numel()==0 or Identity encoder
            return attr
        return _encode_one(attr, prep, tile_n)

    @jax.jit
    def forward(node_attr, edge_attr, glob_attr):
        return (_go(node_attr, node_prep),
                _go(edge_attr, edge_prep),
                _go(glob_attr, glob_prep))

    return forward


# ---------------------------------------------------------------------------
# Deterministic parameter init (shapes follow MLP(1, E, E, ...))
# ---------------------------------------------------------------------------
def init_mlp_params(key, emb_dim: int) -> dict:
    k = jax.random.split(key, 4)
    lim1 = 1.0                       # 1/sqrt(fan_in=1)
    lim2 = 1.0 / (emb_dim ** 0.5)    # 1/sqrt(fan_in=E)
    return dict(
        w1=jax.random.uniform(k[0], (emb_dim, 1), jnp.float32, -lim1, lim1),
        b1=jax.random.uniform(k[1], (emb_dim,), jnp.float32, -lim1, lim1),
        w2=jax.random.uniform(k[2], (emb_dim, emb_dim), jnp.float32, -lim2, lim2),
        b2=jax.random.uniform(k[3], (emb_dim,), jnp.float32, -lim2, lim2),
        gamma=jnp.ones((emb_dim,), jnp.float32),
        beta=jnp.zeros((emb_dim,), jnp.float32),
        rmean=jnp.zeros((emb_dim,), jnp.float32),
        rvar=jnp.ones((emb_dim,), jnp.float32),
    )


# Pure-JAX reference (column-by-column, exactly like the torch forward, eval mode).
def _ref_encode(x, p):
    outs = []
    s = p["gamma"] * jax.lax.rsqrt(p["rvar"] + _BN_EPS)
    for f in range(x.shape[1]):
        h = x[:, f:f + 1] @ p["w1"].T + p["b1"]
        h = (h - p["rmean"]) * s + p["beta"]
        h = jax.nn.gelu(h, approximate=True)
        outs.append(h @ p["w2"].T + p["b2"])
    return jnp.concatenate(outs, axis=-1)


if __name__ == "__main__":
    key = jax.random.PRNGKey(0)
    ks = jax.random.split(key, 6)

    # node: [BN=37, F=4] with E=32 ; edge: [BE=50, F=3] with E=16 ; glob: [B=2, F=2] with E=8
    node_attr = jax.random.normal(ks[0], (37, 4), jnp.float32)
    edge_attr = jax.random.normal(ks[1], (50, 3), jnp.float32)
    glob_attr = jax.random.normal(ks[2], (2, 2), jnp.float32)

    node_p = init_mlp_params(ks[3], 32)
    edge_p = init_mlp_params(ks[4], 16)
    glob_p = init_mlp_params(ks[5], 8)

    # One-time (per parameter set) preparation — outside the per-call hot path.
    forward = make_duplicated_encoder_forward(
        prepare_encoder_params(node_p, node_attr.shape[1]),
        prepare_encoder_params(edge_p, edge_attr.shape[1]),
        prepare_encoder_params(glob_p, glob_attr.shape[1]),
    )

    node_emb, edge_emb, glob_emb = forward(node_attr, edge_attr, glob_attr)
    jax.block_until_ready((node_emb, edge_emb, glob_emb))

    assert node_emb.shape == (37, 4 * 32)
    assert edge_emb.shape == (50, 3 * 16)
    assert glob_emb.shape == (2, 2 * 8)

    for got, (attr, p) in ((node_emb, (node_attr, node_p)),
                           (edge_emb, (edge_attr, edge_p)),
                           (glob_emb, (glob_attr, glob_p))):
        want = _ref_encode(attr, p)
        assert jnp.allclose(got, want, rtol=1e-4, atol=1e-4), "mismatch vs reference"

    print("KERNEL_OK")
</pallas_src>

<mosaic_0001>
module attributes {stable_mosaic.version = 11 : i64} {
  func.func @_dup_mlp_kernel(%arg0: i32, %arg1: memref<32x3xf32, #tpu.memory_space<vmem>>, %arg2: memref<3x128xf32, #tpu.memory_space<vmem>>, %arg3: memref<1x128xf32, #tpu.memory_space<vmem>>, %arg4: memref<128x128xf32, #tpu.memory_space<vmem>>, %arg5: memref<1x128xf32, #tpu.memory_space<vmem>>, %arg6: memref<32x128xf32, #tpu.memory_space<vmem>>) attributes {dimension_semantics = [#tpu.dimension_semantics<parallel>], iteration_bounds = array<i64: 2>, scalar_prefetch = 0 : i64, scratch_operands = 0 : i64, tpu.core_type = #tpu.core_type<tc>, window_params = [{transform_indices = @transform_0, window_bounds = array<i64: 32, 3>}, {pipeline_mode = #tpu.pipeline_mode<synchronous>, transform_indices = @transform_1, window_bounds = array<i64: 3, 128>}, {pipeline_mode = #tpu.pipeline_mode<synchronous>, transform_indices = @transform_2, window_bounds = array<i64: 1, 128>}, {pipeline_mode = #tpu.pipeline_mode<synchronous>, transform_indices = @transform_3, window_bounds = array<i64: 128, 128>}, {pipeline_mode = #tpu.pipeline_mode<synchronous>, transform_indices = @transform_4, window_bounds = array<i64: 1, 128>}, {transform_indices = @transform_5, window_bounds = array<i64: 32, 128>}]} {
    %c0 = arith.constant 0 : index
    %c0_0 = arith.constant 0 : index
    %0 = vector.load %arg1[%c0, %c0_0] : memref<32x3xf32, #tpu.memory_space<vmem>>, vector<32x3xf32>
    %c0_1 = arith.constant 0 : index
    %c0_2 = arith.constant 0 : index
    %1 = vector.load %arg2[%c0_1, %c0_2] : memref<3x128xf32, #tpu.memory_space<vmem>>, vector<3x128xf32>
    %c0_3 = arith.constant 0 : index
    %c0_4 = arith.constant 0 : index
    %2 = vector.load %arg3[%c0_3, %c0_4] : memref<1x128xf32, #tpu.memory_space<vmem>>, vector<1x128xf32>
    %3 = vector.extract_strided_slice %0 {offsets = [0, 0], sizes = [32, 1], strides = [1, 1]} : vector<32x3xf32> to vector<32x1xf32>
    %4 = vector.extract_strided_slice %1 {offsets = [0, 0], sizes = [1, 128], strides = [1, 1]} : vector<3x128xf32> to vector<1x128xf32>
    %5 = vector.broadcast %3 : vector<32x1xf32> to vector<32x128xf32>
    %6 = vector.broadcast %4 : vector<1x128xf32> to vector<32x128xf32>
    %7 = arith.mulf %5, %6 : vector<32x128xf32>
    %8 = vector.broadcast %2 : vector<1x128xf32> to vector<32x128xf32>
    %9 = arith.addf %8, %7 : vector<32x128xf32>
    %10 = vector.extract_strided_slice %0 {offsets = [0, 1], sizes = [32, 1], strides = [1, 1]} : vector<32x3xf32> to vector<32x1xf32>
    %11 = vector.extract_strided_slice %1 {offsets = [1, 0], sizes = [1, 128], strides = [1, 1]} : vector<3x128xf32> to vector<1x128xf32>
    %12 = vector.broadcast %10 : vector<32x1xf32> to vector<32x128xf32>
    %13 = vector.broadcast %11 : vector<1x128xf32> to vector<32x128xf32>
    %14 = arith.mulf %12, %13 : vector<32x128xf32>
    %15 = arith.addf %9, %14 : vector<32x128xf32>
    %16 = vector.extract_strided_slice %0 {offsets = [0, 2], sizes = [32, 1], strides = [1, 1]} : vector<32x3xf32> to vector<32x1xf32>
    %17 = vector.extract_strided_slice %1 {offsets = [2, 0], sizes = [1, 128], strides = [1, 1]} : vector<3x128xf32> to vector<1x128xf32>
    %18 = vector.broadcast %16 : vector<32x1xf32> to vector<32x128xf32>
    %19 = vector.broadcast %17 : vector<1x128xf32> to vector<32x128xf32>
    %20 = arith.mulf %18, %19 : vector<32x128xf32>
    %21 = arith.addf %15, %20 : vector<32x128xf32>
    %22 = arith.mulf %21, %21 : vector<32x128xf32>
    %23 = arith.mulf %21, %22 : vector<32x128xf32>
    %cst = arith.constant 4.471500e-02 : f32
    %24 = vector.broadcast %cst : f32 to vector<32x128xf32>
    %25 = arith.mulf %24, %23 : vector<32x128xf32>
    %26 = arith.addf %21, %25 : vector<32x128xf32>
    %cst_5 = arith.constant 0.797884583 : f32
    %27 = vector.broadcast %cst_5 : f32 to vector<32x128xf32>
    %28 = arith.mulf %27, %26 : vector<32x128xf32>
    %29 = math.tanh %28 : vector<32x128xf32>
    %cst_6 = arith.constant 1.000000e+00 : f32
    %30 = vector.broadcast %cst_6 : f32 to vector<32x128xf32>
    %31 = arith.addf %30, %29 : vector<32x128xf32>
    %cst_7 = arith.constant 5.000000e-01 : f32
    %32 = vector.broadcast %cst_7 : f32 to vector<32x128xf32>
    %33 = arith.mulf %32, %31 : vector<32x128xf32>
    %34 = arith.mulf %21, %33 : vector<32x128xf32>
    %c0_8 = arith.constant 0 : index
    %c0_9 = arith.constant 0 : index
    %35 = vector.load %arg4[%c0_8, %c0_9] : memref<128x128xf32, #tpu.memory_space<vmem>>, vector<128x128xf32>
    %cst_10 = arith.constant dense<0.000000e+00> : vector<32x128xf32>
    %36 = tpu.matmul %34, %35, %cst_10 {dimension_numbers = #tpu.dot_dimension_numbers<[1], [0], [0], [1], [0, 0, 1, 1], [], []>} : vector<32x128xf32>, vector<128x128xf32>, vector<32x128xf32> -> vector<32x128xf32>
    %c0_11 = arith.constant 0 : index
    %c0_12 = arith.constant 0 : index
    %37 = vector.load %arg5[%c0_11, %c0_12] : memref<1x128xf32, #tpu.memory_space<vmem>>, vector<1x128xf32>
    %38 = vector.broadcast %37 : vector<1x128xf32> to vector<32x128xf32>
    %39 = arith.addf %36, %38 : vector<32x128xf32>
    %c0_13 = arith.constant 0 : index
    %c0_14 = arith.constant 0 : index
    %40 = vector.load %arg6[%c0_13, %c0_14] : memref<32x128xf32, #tpu.memory_space<vmem>>, vector<32x128xf32>
    tpu.vector_store %arg6[%c0_13, %c0_14], %39 {strides = array<i32>} : memref<32x128xf32, #tpu.memory_space<vmem>>, vector<32x128xf32>,
    return
  }
  func.func @transform_0(%arg0: i32) -> (i32, i32) {
    %c0_i32 = arith.constant 0 : i32
    %c0_i32_0 = arith.constant 0 : i32
    return %arg0, %c0_i32 : i32, i32
  }
  func.func @transform_1(%arg0: i32) -> (i32, i32) {
    %c0_i32 = arith.constant 0 : i32
    %c0_i32_0 = arith.constant 0 : i32
    %c0_i32_1 = arith.constant 0 : i32
    return %c0_i32, %c0_i32_0 : i32, i32
  }
  func.func @transform_2(%arg0: i32) -> (i32, i32) {
    %c0_i32 = arith.constant 0 : i32
    %c0_i32_0 = arith.constant 0 : i32
    %c0_i32_1 = arith.constant 0 : i32
    return %c0_i32, %c0_i32_0 : i32, i32
  }
  func.func @transform_3(%arg0: i32) -> (i32, i32) {
    %c0_i32 = arith.constant 0 : i32
    %c0_i32_0 = arith.constant 0 : i32
    %c0_i32_1 = arith.constant 0 : i32
    return %c0_i32, %c0_i32_0 : i32, i32
  }
  func.func @transform_4(%arg0: i32) -> (i32, i32) {
    %c0_i32 = arith.constant 0 : i32
    %c0_i32_0 = arith.constant 0 : i32
    %c0_i32_1 = arith.constant 0 : i32
    return %c0_i32, %c0_i32_0 : i32, i32
  }
  func.func @transform_5(%arg0: i32) -> (i32, i32) {
    %c0_i32 = arith.constant 0 : i32
    %c0_i32_0 = arith.constant 0 : i32
    return %arg0, %c0_i32 : i32, i32
  }
}

module attributes {stable_mosaic.version = 11 : i64} {
  func.func @_dup_mlp_kernel(%arg0: i32, %arg1: memref<24x4xf32, #tpu.memory_space<vmem>>, %arg2: memref<4x128xf32, #tpu.memory_space<vmem>>, %arg3: memref<1x128xf32, #tpu.memory_space<vmem>>, %arg4: memref<128x128xf32, #tpu.memory_space<vmem>>, %arg5: memref<1x128xf32, #tpu.memory_space<vmem>>, %arg6: memref<24x128xf32, #tpu.memory_space<vmem>>) attributes {dimension_semantics = [#tpu.dimension_semantics<parallel>], iteration_bounds = array<i64: 2>, scalar_prefetch = 0 : i64, scratch_operands = 0 : i64, tpu.core_type = #tpu.core_type<tc>, window_params = [{transform_indices = @transform_0, window_bounds = array<i64: 24, 4>}, {pipeline_mode = #tpu.pipeline_mode<synchronous>, transform_indices = @transform_1, window_bounds = array<i64: 4, 128>}, {pipeline_mode = #tpu.pipeline_mode<synchronous>, transform_indices = @transform_2, window_bounds = array<i64: 1, 128>}, {pipeline_mode = #tpu.pipeline_mode<synchronous>, transform_indices = @transform_3, window_bounds = array<i64: 128, 128>}, {pipeline_mode = #tpu.pipeline_mode<synchronous>, transform_indices = @transform_4, window_bounds = array<i64: 1, 128>}, {transform_indices = @transform_5, window_bounds = array<i64: 24, 128>}]} {
    %c0 = arith.constant 0 : index
    %c0_0 = arith.constant 0 : index
    %0 = vector.load %arg1[%c0, %c0_0] : memref<24x4xf32, #tpu.memory_space<vmem>>, vector<24x4xf32>
    %c0_1 = arith.constant 0 : index
    %c0_2 = arith.constant 0 : index
    %1 = vector.load %arg2[%c0_1, %c0_2] : memref<4x128xf32, #tpu.memory_space<vmem>>, vector<4x128xf32>
    %c0_3 = arith.constant 0 : index
    %c0_4 = arith.constant 0 : index
    %2 = vector.load %arg3[%c0_3, %c0_4] : memref<1x128xf32, #tpu.memory_space<vmem>>, vector<1x128xf32>
    %3 = vector.extract_strided_slice %0 {offsets = [0, 0], sizes = [24, 1], strides = [1, 1]} : vector<24x4xf32> to vector<24x1xf32>
    %4 = vector.extract_strided_slice %1 {offsets = [0, 0], sizes = [1, 128], strides = [1, 1]} : vector<4x128xf32> to vector<1x128xf32>
    %5 = vector.broadcast %3 : vector<24x1xf32> to vector<24x128xf32>
    %6 = vector.broadcast %4 : vector<1x128xf32> to vector<24x128xf32>
    %7 = arith.mulf %5, %6 : vector<24x128xf32>
    %8 = vector.broadcast %2 : vector<1x128xf32> to vector<24x128xf32>
    %9 = arith.addf %8, %7 : vector<24x128xf32>
    %10 = vector.extract_strided_slice %0 {offsets = [0, 1], sizes = [24, 1], strides = [1, 1]} : vector<24x4xf32> to vector<24x1xf32>
    %11 = vector.extract_strided_slice %1 {offsets = [1, 0], sizes = [1, 128], strides = [1, 1]} : vector<4x128xf32> to vector<1x128xf32>
    %12 = vector.broadcast %10 : vector<24x1xf32> to vector<24x128xf32>
    %13 = vector.broadcast %11 : vector<1x128xf32> to vector<24x128xf32>
    %14 = arith.mulf %12, %13 : vector<24x128xf32>
    %15 = arith.addf %9, %14 : vector<24x128xf32>
    %16 = vector.extract_strided_slice %0 {offsets = [0, 2], sizes = [24, 1], strides = [1, 1]} : vector<24x4xf32> to vector<24x1xf32>
    %17 = vector.extract_strided_slice %1 {offsets = [2, 0], sizes = [1, 128], strides = [1, 1]} : vector<4x128xf32> to vector<1x128xf32>
    %18 = vector.broadcast %16 : vector<24x1xf32> to vector<24x128xf32>
    %19 = vector.broadcast %17 : vector<1x128xf32> to vector<24x128xf32>
    %20 = arith.mulf %18, %19 : vector<24x128xf32>
    %21 = arith.addf %15, %20 : vector<24x128xf32>
    %22 = vector.extract_strided_slice %0 {offsets = [0, 3], sizes = [24, 1], strides = [1, 1]} : vector<24x4xf32> to vector<24x1xf32>
    %23 = vector.extract_strided_slice %1 {offsets = [3, 0], sizes = [1, 128], strides = [1, 1]} : vector<4x128xf32> to vector<1x128xf32>
    %24 = vector.broadcast %22 : vector<24x1xf32> to vector<24x128xf32>
    %25 = vector.broadcast %23 : vector<1x128xf32> to vector<24x128xf32>
    %26 = arith.mulf %24, %25 : vector<24x128xf32>
    %27 = arith.addf %21, %26 : vector<24x128xf32>
    %28 = arith.mulf %27, %27 : vector<24x128xf32>
    %29 = arith.mulf %27, %28 : vector<24x128xf32>
    %cst = arith.constant 4.471500e-02 : f32
    %30 = vector.broadcast %cst : f32 to vector<24x128xf32>
    %31 = arith.mulf %30, %29 : vector<24x128xf32>
    %32 = arith.addf %27, %31 : vector<24x128xf32>
    %cst_5 = arith.constant 0.797884583 : f32
    %33 = vector.broadcast %cst_5 : f32 to vector<24x128xf32>
    %34 = arith.mulf %33, %32 : vector<24x128xf32>
    %35 = math.tanh %34 : vector<24x128xf32>
    %cst_6 = arith.constant 1.000000e+00 : f32
    %36 = vector.broadcast %cst_6 : f32 to vector<24x128xf32>
    %37 = arith.addf %36, %35 : vector<24x128xf32>
    %cst_7 = arith.constant 5.000000e-01 : f32
    %38 = vector.broadcast %cst_7 : f32 to vector<24x128xf32>
    %39 = arith.mulf %38, %37 : vector<24x128xf32>
    %40 = arith.mulf %27, %39 : vector<24x128xf32>
    %c0_8 = arith.constant 0 : index
    %c0_9 = arith.constant 0 : index
    %41 = vector.load %arg4[%c0_8, %c0_9] : memref<128x128xf32, #tpu.memory_space<vmem>>, vector<128x128xf32>
    %cst_10 = arith.constant dense<0.000000e+00> : vector<24x128xf32>
    %42 = tpu.matmul %40, %41, %cst_10 {dimension_numbers = #tpu.dot_dimension_numbers<[1], [0], [0], [1], [0, 0, 1, 1], [], []>} : vector<24x128xf32>, vector<128x128xf32>, vector<24x128xf32> -> vector<24x128xf32>
    %c0_11 = arith.constant 0 : index
    %c0_12 = arith.constant 0 : index
    %43 = vector.load %arg5[%c0_11, %c0_12] : memref<1x128xf32, #tpu.memory_space<vmem>>, vector<1x128xf32>
    %44 = vector.broadcast %43 : vector<1x128xf32> to vector<24x128xf32>
    %45 = arith.addf %42, %44 : vector<24x128xf32>
    %c0_13 = arith.constant 0 : index
    %c0_14 = arith.constant 0 : index
    %46 = vector.load %arg6[%c0_13, %c0_14] : memref<24x128xf32, #tpu.memory_space<vmem>>, vector<24x128xf32>
    tpu.vector_store %arg6[%c0_13, %c0_14], %45 {strides = array<i32>} : memref<24x128xf32, #tpu.memory_space<vmem>>, vector<24x128xf32>,
    return
  }
  func.func @transform_0(%arg0: i32) -> (i32, i32) {
    %c0_i32 = arith.constant 0 : i32
    %c0_i32_0 = arith.constant 0 : i32
    return %arg0, %c0_i32 : i32, i32
  }
  func.func @transform_1(%arg0: i32) -> (i32, i32) {
    %c0_i32 = arith.constant 0 : i32
    %c0_i32_0 = arith.constant 0 : i32
    %c0_i32_1 = arith.constant 0 : i32
    return %c0_i32, %c0_i32_0 : i32, i32
  }
  func.func @transform_2(%arg0: i32) -> (i32, i32) {
    %c0_i32 = arith.constant 0 : i32
    %c0_i32_0 = arith.constant 0 : i32
    %c0_i32_1 = arith.constant 0 : i32
    return %c0_i32, %c0_i32_0 : i32, i32
  }
  func.func @transform_3(%arg0: i32) -> (i32, i32) {
    %c0_i32 = arith.constant 0 : i32
    %c0_i32_0 = arith.constant 0 : i32
    %c0_i32_1 = arith.constant 0 : i32
    return %c0_i32, %c0_i32_0 : i32, i32
  }
  func.func @transform_4(%arg0: i32) -> (i32, i32) {
    %c0_i32 = arith.constant 0 : i32
    %c0_i32_0 = arith.constant 0 : i32
    %c0_i32_1 = arith.constant 0 : i32
    return %c0_i32, %c0_i32_0 : i32, i32
  }
  func.func @transform_5(%arg0: i32) -> (i32, i32) {
    %c0_i32 = arith.constant 0 : i32
    %c0_i32_0 = arith.constant 0 : i32
    return %arg0, %c0_i32 : i32, i32
  }
}

module attributes {stable_mosaic.version = 11 : i64} {
  func.func @_dup_mlp_kernel(%arg0: i32, %arg1: memref<8x2xf32, #tpu.memory_space<vmem>>, %arg2: memref<2x128xf32, #tpu.memory_space<vmem>>, %arg3: memref<1x128xf32, #tpu.memory_space<vmem>>, %arg4: memref<128x128xf32, #tpu.memory_space<vmem>>, %arg5: memref<1x128xf32, #tpu.memory_space<vmem>>, %arg6: memref<8x128xf32, #tpu.memory_space<vmem>>) attributes {dimension_semantics = [#tpu.dimension_semantics<parallel>], iteration_bounds = array<i64: 1>, scalar_prefetch = 0 : i64, scratch_operands = 0 : i64, tpu.core_type = #tpu.core_type<tc>, window_params = [{transform_indices = @transform_0, window_bounds = array<i64: 8, 2>}, {pipeline_mode = #tpu.pipeline_mode<synchronous>, transform_indices = @transform_1, window_bounds = array<i64: 2, 128>}, {pipeline_mode = #tpu.pipeline_mode<synchronous>, transform_indices = @transform_2, window_bounds = array<i64: 1, 128>}, {pipeline_mode = #tpu.pipeline_mode<synchronous>, transform_indices = @transform_3, window_bounds = array<i64: 128, 128>}, {pipeline_mode = #tpu.pipeline_mode<synchronous>, transform_indices = @transform_4, window_bounds = array<i64: 1, 128>}, {transform_indices = @transform_5, window_bounds = array<i64: 8, 128>}]} {
    %c0 = arith.constant 0 : index
    %c0_0 = arith.constant 0 : index
    %0 = vector.load %arg1[%c0, %c0_0] : memref<8x2xf32, #tpu.memory_space<vmem>>, vector<8x2xf32>
    %c0_1 = arith.constant 0 : index
    %c0_2 = arith.constant 0 : index
    %1 = vector.load %arg2[%c0_1, %c0_2] : memref<2x128xf32, #tpu.memory_space<vmem>>, vector<2x128xf32>
    %c0_3 = arith.constant 0 : index
    %c0_4 = arith.constant 0 : index
    %2 = vector.load %arg3[%c0_3, %c0_4] : memref<1x128xf32, #tpu.memory_space<vmem>>, vector<1x128xf32>
    %3 = vector.extract_strided_slice %0 {offsets = [0, 0], sizes = [8, 1], strides = [1, 1]} : vector<8x2xf32> to vector<8x1xf32>
    %4 = vector.extract_strided_slice %1 {offsets = [0, 0], sizes = [1, 128], strides = [1, 1]} : vector<2x128xf32> to vector<1x128xf32>
    %5 = vector.broadcast %3 : vector<8x1xf32> to vector<8x128xf32>
    %6 = vector.broadcast %4 : vector<1x128xf32> to vector<8x128xf32>
    %7 = arith.mulf %5, %6 : vector<8x128xf32>
    %8 = vector.broadcast %2 : vector<1x128xf32> to vector<8x128xf32>
    %9 = arith.addf %8, %7 : vector<8x128xf32>
    %10 = vector.extract_strided_slice %0 {offsets = [0, 1], sizes = [8, 1], strides = [1, 1]} : vector<8x2xf32> to vector<8x1xf32>
    %11 = vector.extract_strided_slice %1 {offsets = [1, 0], sizes = [1, 128], strides = [1, 1]} : vector<2x128xf32> to vector<1x128xf32>
    %12 = vector.broadcast %10 : vector<8x1xf32> to vector<8x128xf32>
    %13 = vector.broadcast %11 : vector<1x128xf32> to vector<8x128xf32>
    %14 = arith.mulf %12, %13 : vector<8x128xf32>
    %15 = arith.addf %9, %14 : vector<8x128xf32>
    %16 = arith.mulf %15, %15 : vector<8x128xf32>
    %17 = arith.mulf %15, %16 : vector<8x128xf32>
    %cst = arith.constant 4.471500e-02 : f32
    %18 = vector.broadcast %cst : f32 to vector<8x128xf32>
    %19 = arith.mulf %18, %17 : vector<8x128xf32>
    %20 = arith.addf %15, %19 : vector<8x128xf32>
    %cst_5 = arith.constant 0.797884583 : f32
    %21 = vector.broadcast %cst_5 : f32 to vector<8x128xf32>
    %22 = arith.mulf %21, %20 : vector<8x128xf32>
    %23 = math.tanh %22 : vector<8x128xf32>
    %cst_6 = arith.constant 1.000000e+00 : f32
    %24 = vector.broadcast %cst_6 : f32 to vector<8x128xf32>
    %25 = arith.addf %24, %23 : vector<8x128xf32>
    %cst_7 = arith.constant 5.000000e-01 : f32
    %26 = vector.broadcast %cst_7 : f32 to vector<8x128xf32>
    %27 = arith.mulf %26, %25 : vector<8x128xf32>
    %28 = arith.mulf %15, %27 : vector<8x128xf32>
    %c0_8 = arith.constant 0 : index
    %c0_9 = arith.constant 0 : index
    %29 = vector.load %arg4[%c0_8, %c0_9] : memref<128x128xf32, #tpu.memory_space<vmem>>, vector<128x128xf32>
    %cst_10 = arith.constant dense<0.000000e+00> : vector<8x128xf32>
    %30 = tpu.matmul %28, %29, %cst_10 {dimension_numbers = #tpu.dot_dimension_numbers<[1], [0], [0], [1], [0, 0, 1, 1], [], []>} : vector<8x128xf32>, vector<128x128xf32>, vector<8x128xf32> -> vector<8x128xf32>
    %c0_11 = arith.constant 0 : index
    %c0_12 = arith.constant 0 : index
    %31 = vector.load %arg5[%c0_11, %c0_12] : memref<1x128xf32, #tpu.memory_space<vmem>>, vector<1x128xf32>
    %32 = vector.broadcast %31 : vector<1x128xf32> to vector<8x128xf32>
    %33 = arith.addf %30, %32 : vector<8x128xf32>
    %c0_13 = arith.constant 0 : index
    %c0_14 = arith.constant 0 : index
    %34 = vector.load %arg6[%c0_13, %c0_14] : memref<8x128xf32, #tpu.memory_space<vmem>>, vector<8x128xf32>
    tpu.vector_store %arg6[%c0_13, %c0_14], %33 {strides = array<i32>} : memref<8x128xf32, #tpu.memory_space<vmem>>, vector<8x128xf32>,
    return
  }
  func.func @transform_0(%arg0: i32) -> (i32, i32) {
    %c0_i32 = arith.constant 0 : i32
    %c0_i32_0 = arith.constant 0 : i32
    return %arg0, %c0_i32 : i32, i32
  }
  func.func @transform_1(%arg0: i32) -> (i32, i32) {
    %c0_i32 = arith.constant 0 : i32
    %c0_i32_0 = arith.constant 0 : i32
    %c0_i32_1 = arith.constant 0 : i32
    return %c0_i32, %c0_i32_0 : i32, i32
  }
  func.func @transform_2(%arg0: i32) -> (i32, i32) {
    %c0_i32 = arith.constant 0 : i32
    %c0_i32_0 = arith.constant 0 : i32
    %c0_i32_1 = arith.constant 0 : i32
    return %c0_i32, %c0_i32_0 : i32, i32
  }
  func.func @transform_3(%arg0: i32) -> (i32, i32) {
    %c0_i32 = arith.constant 0 : i32
    %c0_i32_0 = arith.constant 0 : i32
    %c0_i32_1 = arith.constant 0 : i32
    return %c0_i32, %c0_i32_0 : i32, i32
  }
  func.func @transform_4(%arg0: i32) -> (i32, i32) {
    %c0_i32 = arith.constant 0 : i32
    %c0_i32_0 = arith.constant 0 : i32
    %c0_i32_1 = arith.constant 0 : i32
    return %c0_i32, %c0_i32_0 : i32, i32
  }
  func.func @transform_5(%arg0: i32) -> (i32, i32) {
    %c0_i32 = arith.constant 0 : i32
    %c0_i32_0 = arith.constant 0 : i32
    return %arg0, %c0_i32 : i32, i32
  }
}

</mosaic_0001>

<bundles_post_ra>
// kernel: forward.4
= control target key start
LH: loop header
LB: loop body
LE: loop exit
PB: predicated region body
PF: predicated region fallthrough
CT: control target
= control target key end

     0   :  { %s591_s18 = smov 0   ;;  %s672_s0 = inlined_call_operand.vmem [shape: f32[64,3], index: 0, kind: input, shape index: {}]   ;;  %s673_s1 = inlined_call_operand.vmem [shape: f32[3,128], index: 1, kind: input, shape index: {}]   ;;  %s674_s2 = inlined_call_operand.vmem [shape: f32[1,128], index: 2, kind: input, shape index: {}]   ;;  %s675_s3 = inlined_call_operand.vmem [shape: f32[128,128], index: 3, kind: input, shape index: {}]   ;;  %s676_s4 = inlined_call_operand.vmem [shape: f32[1,128], index: 4, kind: input, shape index: {}]   ;;  %s677_s5 = inlined_call_operand.vmem [shape: f32[64,128], index: 5, kind: output, shape index: {}]  }
   0x1 LB: > { %s461_s19 = sadd.s32 4294967295, %s556_s18   ;;  %p465_p0 = scmp.ge.s32.totalorder %s556_s18, 1  ;;  %s556_s18 = sphi %s591_s18, %s15_s18  }
   0x2   : > { %p188_p1 = scmp.lt.s32.totalorder %s556_s18, 3 }
   0x4   : > { %p189_p2 = pnand %p465_p0, %p188_p1 }
   0x5   : > { %s466_s20 = sshll.u32 (!%p189_p2), %s461_s19, 2 }
   0x6   : > { %192 = sbr.rel (%p189_p2) target bundleno = 313 (0x139), region = 40  ;;  %p217_p3 = scmp.lt.s32.totalorder (!%p189_p2), %s466_s20, 7 }
   0xb   : > { %v558_v0 = vmov 1   ;;  %v559_v1 = vmov 0   ;;  %s679_s20 = smov (!%p217_p3, %s466_s20), 7  ;;  %v560_v5 = vmov 2   ;;  %v367_v7 = vld [vmem:[%s675_s3 + $0x78] sm:$0xff]  ;;  %v366_v8 = vld [vmem:[%s675_s3 + $0x70] sm:$0xff] }
   0xc   : > { %532 = vset.pattern.permute.xlu1 %v558_v0  ;;  %531 = vset.pattern.permute.xlu0 %v559_v1  ;;  %s467_s21 = sshll.u32 %s679_s20, 3  ;;  %v365_v9 = vld [vmem:[%s675_s3 + $0x68] sm:$0xff]  ;;  %v364_v10 = vld [vmem:[%s675_s3 + $0x60] sm:$0xff]  ;;  %v363_v11 = vld [vmem:[%s675_s3 + $0x58] sm:$0xff] }
   0xd   : > { %533 = vset.pattern.permute.xlu2 %v559_v1  ;;  %s220_s24 = scalar_lea.vmem %s672_s0, %s467_s21  ;;  %473 = vmatpush.msra.mxu2 %v367_v7  ;;  %v362_v12 = vld [vmem:[%s675_s3 + $0x50] sm:$0xff]  ;;  %v361_v13 = vld [vmem:[%s675_s3 + $0x48] sm:$0xff]  ;;  %v360_v14 = vld [vmem:[%s675_s3 + $0x40] sm:$0xff]  ;;  %s226_s19 = scalar_lea.vmem %s677_s5, %s467_s21 }
   0xe   : > { %v230_v2 = vld [vmem:[%s220_s24 + $0x10] sm:$0xff]  ;;  %v228_v3 = vld [vmem:[%s220_s24] sm:$0xff]  ;;  %v231_v4 = vld [vmem:[%s220_s24 + $0x18] sm:$0xff]  ;;  %474 = vmatpush.msra.mxu3 %v367_v7  ;;  %372 = vmatpush.msra.mxu0 %v367_v7 }
   0xf   : > { %275 = vperm.xlu1 %532, %v230_v2   ;;  %246 = vperm.xlu0 %531, %v230_v2   ;;  %v229_v6 = vld [vmem:[%s220_s24 + $0x8] sm:$0xff]  ;;  %v359_v15 = vld [vmem:[%s675_s3 + $0x38] sm:$0xff]  ;;  %v358_v16 = vld [vmem:[%s675_s3 + $0x30] sm:$0xff] }
  0x10   : > { %236 = vperm.xlu2 %533, %v228_v3   ;;  %472 = vmatpush.msra.mxu1 %v367_v7  ;;  %v357_v17 = vld [vmem:[%s675_s3 + $0x28] sm:$0xff]  ;;  %v356_v18 = vld [vmem:[%s675_s3 + $0x20] sm:$0xff]  ;;  %v355_v19 = vld [vmem:[%s675_s3 + $0x18] sm:$0xff] }
  0x11   : > { %476 = vmatpush.msra.mxu2 %v366_v8  ;;  %477 = vmatpush.msra.mxu3 %v366_v8  ;;  %v232_v21 = vld [vmem:[%s673_s1] sm:$0x7]  ;;  %v354_v22 = vld [vmem:[%s675_s3 + $0x10] sm:$0xff]  ;;  %v353_v23 = vld [vmem:[%s675_s3 + $0x8] sm:$0xff] }
  0x12   : > { %373 = vmatpush.msra.mxu0 %v366_v8  ;;  %475 = vmatpush.msra.mxu1 %v366_v8  ;;  %v254_v24 = vperm.slane %v232_v21, 0  ;;  %v282_v25 = vperm.slane %v232_v21, 1  ;;  %v352_v26 = vld [vmem:[%s675_s3] sm:$0xff]  ;;  %v307_v28 = vperm.slane %v232_v21, 2 }
  0x13   : > { %479 = vmatpush.msra.mxu2 %v365_v9  ;;  %480 = vmatpush.msra.mxu3 %v365_v9  ;;  %v540_v27 = vld [vmem:[%s674_s2] ss:$0 sm:$0xff] }
  0x14   : > { %374 = vmatpush.msra.mxu0 %v365_v9  ;;  %478 = vmatpush.msra.mxu1 %v365_v9 }
  0x15   : > { %482 = vmatpush.msra.mxu2 %v364_v10  ;;  %483 = vmatpush.msra.mxu3 %v364_v10 }
  0x16   : > { %375 = vmatpush.msra.mxu0 %v364_v10  ;;  %481 = vmatpush.msra.mxu1 %v364_v10 }
  0x17   : > { %279 = vperm.xlu1 %532, %v231_v4   ;;  %251 = vperm.xlu0 %531, %v231_v4  }
  0x18   : > { %534 = vset.pattern.permute.xlu2 %v560_v5  ;;  %485 = vmatpush.msra.mxu2 %v363_v11 }
  0x19   : > { %300 = vperm.xlu2 %534, %v230_v2   ;;  %486 = vmatpush.msra.mxu3 %v363_v11 }
  0x1a   : > { %376 = vmatpush.msra.mxu0 %v363_v11  ;;  %484 = vmatpush.msra.mxu1 %v363_v11 }
  0x1b   : > { %488 = vmatpush.msra.mxu2 %v362_v12  ;;  %489 = vmatpush.msra.mxu3 %v362_v12 }
  0x1c   : > { %377 = vmatpush.msra.mxu0 %v362_v12  ;;  %487 = vmatpush.msra.mxu1 %v362_v12 }
  0x1d   : > { %491 = vmatpush.msra.mxu2 %v361_v13  ;;  %492 = vmatpush.msra.mxu3 %v361_v13 }
  0x1e   : > { %378 = vmatpush.msra.mxu0 %v361_v13  ;;  %490 = vmatpush.msra.mxu1 %v361_v13 }
  0x1f   : > { %535 = vset.pattern.permute.xlu1 %v560_v5  ;;  %241 = vperm.xlu0 %531, %v229_v6  }
  0x20   : > { %304 = vperm.xlu1 %535, %v231_v4   ;;  %494 = vmatpush.msra.mxu2 %v360_v14 }
  0x21   : > { %536 = vset.pattern.permute.xlu2 %v558_v0  ;;  %495 = vmatpush.msra.mxu3 %v360_v14 }
  0x22   : > { %267 = vperm.xlu2 %536, %v228_v3   ;;  %379 = vmatpush.msra.mxu0 %v360_v14 }
  0x23   : > { %493 = vmatpush.msra.mxu1 %v360_v14  ;;  %497 = vmatpush.msra.mxu2 %v359_v15 }
  0x24   : > { %498 = vmatpush.msra.mxu3 %v359_v15  ;;  %380 = vmatpush.msra.mxu0 %v359_v15 }
  0x25   : > { %496 = vmatpush.msra.mxu1 %v359_v15  ;;  %500 = vmatpush.msra.mxu2 %v358_v16 }
  0x26   : > { %501 = vmatpush.msra.mxu3 %v358_v16  ;;  %381 = vmatpush.msra.mxu0 %v358_v16 }
  0x27   : > { %537 = vset.pattern.permute.xlu0 %v558_v0  ;;  %499 = vmatpush.msra.mxu1 %v358_v16 }
  0x28   : > { %271 = vperm.xlu0 %537, %v229_v6   ;;  %292 = vperm.xlu1 %535, %v228_v3  }
  0x29   : > { %503 = vmatpush.msra.mxu2 %v357_v17  ;;  %504 = vmatpush.msra.mxu3 %v357_v17 }
  0x2a   : > { %538 = vset.pattern.permute.xlu2 %v560_v5  ;;  %382 = vmatpush.msra.mxu0 %v357_v17 }
  0x2b   : > { %296 = vperm.xlu2 %538, %v229_v6   ;;  %502 = vmatpush.msra.mxu1 %v357_v17 }
  0x2c   : > { %506 = vmatpush.msra.mxu2 %v356_v18  ;;  %507 = vmatpush.msra.mxu3 %v356_v18 }
  0x2d   : > { %383 = vmatpush.msra.mxu0 %v356_v18  ;;  %505 = vmatpush.msra.mxu1 %v356_v18 }
  0x2e   : > { %509 = vmatpush.msra.mxu2 %v355_v19  ;;  %510 = vmatpush.msra.mxu3 %v355_v19 }
  0x2f   : > { %384 = vmatpush.msra.mxu0 %v355_v19  ;;  %508 = vmatpush.msra.mxu1 %v355_v19 }
  0x30   : > { %539 = vset.pattern.permute.xlu0 %v560_v5  ;;  %512 = vmatpush.msra.mxu2 %v354_v22 }
  0x31   : > { %513 = vmatpush.msra.mxu3 %v354_v22  ;;  %385 = vmatpush.msra.mxu0 %v354_v22 }
  0x32   : > { %511 = vmatpush.msra.mxu1 %v354_v22  ;;  %515 = vmatpush.msra.mxu2 %v353_v23 }
  0x33   : > { %516 = vmatpush.msra.mxu3 %v353_v23  ;;  %386 = vmatpush.msra.mxu0 %v353_v23 }
  0x34   : > { %514 = vmatpush.msra.mxu1 %v353_v23  ;;  %518 = vmatpush.msra.mxu2 %v352_v26 }
  0x35   : > { %519 = vmatpush.msra.mxu3 %v352_v26  ;;  %387 = vmatpush.msra.mxu0 %v352_v26 }
  0x36   : > { %517 = vmatpush.msra.mxu1 %v352_v26 }
  0x6a   : > { %v237_v20 = vpop.permute.xlu2 %236 }
  0x6b   : > { %v255_v49 = vmul.f32 %v254_v24, %v237_v20 }
  0x6d   : > { %v262_v55 = vadd.f32 %v540_v27, %v255_v49 }
  0x73   : > { %v301_v33 = vpop.permute.xlu2 %300 }
  0x74   : > { %v310_v34 = vmul.f32 %v307_v28, %v301_v33 }
  0x7c   : > { %v268_v44 = vpop.permute.xlu2 %267 }
  0x7d   : > { %v283_v56 = vmul.f32 %v282_v25, %v268_v44 }
  0x7f   : > { %v287_v62 = vadd.f32 %v283_v56, %v262_v55 }
  0x81   : > { %v276_v29 = vpop.permute.xlu1 %275  ;;  %v247_v30 = vpop.permute.xlu0 %246 }
  0x82   : > { %v285_v31 = vmul.f32 %v282_v25, %v276_v29  ;;  %v257_v32 = vmul.f32 %v254_v24, %v247_v30 }
  0x84   : > { %v264_v35 = vadd.f32 %v540_v27, %v257_v32 }
  0x85   : > { %v297_v59 = vpop.permute.xlu2 %296 }
  0x86   : > { %v289_v36 = vadd.f32 %v285_v31, %v264_v35  ;;  %v309_v2 = vmul.f32 %v307_v28, %v297_v59 }
  0x88   : > { %v314_v37 = vadd.f32 %v310_v34, %v289_v36  ;;  %v541_v36 = vld [vmem:[%s676_s4] ss:$0 sm:$0xff] }
  0x89   : > { %v280_v38 = vpop.permute.xlu1 %279  ;;  %v252_v39 = vpop.permute.xlu0 %251 }
  0x8a   : > { %v318_v40 = vmul.f32 %v314_v37, %v314_v37  ;;  %v258_v41 = vmul.f32 %v254_v24, %v252_v39  ;;  %v286_v47 = vmul.f32 %v282_v25, %v280_v38 }
  0x8c   : > { %v322_v42 = vmul.f32 %v318_v40, %v314_v37  ;;  %v265_v45 = vadd.f32 %v540_v27, %v258_v41 }
  0x8e   : > { %v326_v43 = vmul.f32 0.044715, %v322_v42  ;;  %v290_v52 = vadd.f32 %v286_v47, %v265_v45 }
  0x90   : > { %v330_v46 = vadd.f32 %v326_v43, %v314_v37 }
  0x91   : > { %v242_v48 = vpop.permute.xlu0 %241 }
  0x92   : > { %v305_v50 = vpop.permute.xlu1 %304  ;;  %v334_v51 = vmul.f32 0.7978846, %v330_v46  ;;  %v256_v57 = vmul.f32 %v254_v24, %v242_v48 }
  0x93   : > { %v311_v53 = vmul.f32 %v307_v28, %v305_v50 }
  0x94   : > { %542 = vtanh.f32 %v334_v51  ;;  %v263_v63 = vadd.f32 %v540_v27, %v256_v57 }
  0x95   : > { %v315_v54 = vadd.f32 %v311_v53, %v290_v52 }
  0x97   : > { %v319_v58 = vmul.f32 %v315_v54, %v315_v54 }
  0x99   : > { %v323_v60 = vmul.f32 %v319_v58, %v315_v54 }
  0x9a   : > { %v543_v61 = vpop.eup %542  ;;  %v272_v0 = vpop.permute.xlu0 %271 }
  0x9b   : > { %v293_v1 = vpop.permute.xlu1 %292  ;;  %v284_v3 = vmul.f32 %v282_v25, %v272_v0  ;;  %v342_v5 = vadd.f32 1.0, %v543_v61  ;;  %v327_v6 = vmul.f32 0.044715, %v323_v60 }
  0x9c   : > { %v308_v4 = vmul.f32 %v307_v28, %v293_v1 }
  0x9d   : > { %v288_v7 = vadd.f32 %v284_v3, %v263_v63  ;;  %v346_v9 = vmul.f32 0.5, %v342_v5  ;;  %v331_v10 = vadd.f32 %v327_v6, %v315_v54 }
  0x9e   : > { %v312_v8 = vadd.f32 %v308_v4, %v287_v62 }
  0x9f   : > { %v313_v12 = vadd.f32 %v309_v2, %v288_v7  ;;  %v350_v13 = vmul.f32 %v346_v9, %v314_v37  ;;  %v335_v14 = vmul.f32 0.7978846, %v331_v10 }
  0xa0   : > { %v316_v11 = vmul.f32 %v312_v8, %v312_v8 }
  0xa1   : > { %v317_v15 = vmul.f32 %v313_v12, %v313_v12  ;;  %394 = vmatmul.f32.vlgmr.msra.gmra.mxu2 %v350_v13  ;;  %544 = vtanh.f32 %v335_v14 }
  0xa2   : > { %v320_v16 = vmul.f32 %v316_v11, %v312_v8 }
  0xa3   : > { %v321_v18 = vmul.f32 %v317_v15, %v313_v12 }
  0xa4   : > { %v324_v17 = vmul.f32 0.044715, %v320_v16 }
  0xa5   : > { %v325_v20 = vmul.f32 0.044715, %v321_v18 }
  0xa6   : > { %v328_v19 = vadd.f32 %v324_v17, %v312_v8 }
  0xa7   : > { %v545_v21 = vpop.eup %544  ;;  %v329_v23 = vadd.f32 %v325_v20, %v313_v12 }
  0xa8   : > { %v332_v22 = vmul.f32 0.7978846, %v328_v19  ;;  %v343_v24 = vadd.f32 1.0, %v545_v21 }
  0xa9   : > { %v333_v25 = vmul.f32 0.7978846, %v329_v23 }
  0xaa   : > { %546 = vtanh.f32 %v332_v22  ;;  %v347_v26 = vmul.f32 0.5, %v343_v24 }
  0xab   : > { %548 = vtanh.f32 %v333_v25 }
  0xac   : > { %v351_v27 = vmul.f32 %v347_v26, %v315_v54 }
  0xae   : > { %397 = vmatmul.f32.vlgmr.msra.gmra.mxu3 %v351_v27 }
  0xb0   : > { %v547_v28 = vpop.eup %546 }
  0xb1   : > { %v340_v29 = vadd.f32 1.0, %v547_v28  ;;  %v549_v30 = vpop.eup %548 }
  0xb2   : > { %v341_v32 = vadd.f32 1.0, %v549_v30 }
  0xb3   : > { %v344_v31 = vmul.f32 0.5, %v340_v29 }
  0xb4   : > { %v345_v34 = vmul.f32 0.5, %v341_v32 }
  0xb5   : > { %v348_v33 = vmul.f32 %v344_v31, %v312_v8 }
  0xb6   : > { %v349_v35 = vmul.f32 %v345_v34, %v313_v12 }
  0xb7   : > { %388 = vmatmul.f32.vlgmr.msra.gmra.mxu0 %v348_v33 }
  0xb8   : > { %391 = vmatmul.f32.vlgmr.msra.gmra.mxu1 %v349_v35 }
 0x124   : > { %v395_v38 = vpop.f32.mrf.mxu2 }
 0x125   : > { %v396_v43 = vadd.f32 %v541_v36, %v395_v38 }
 0x127   : > { %403 = vst [vmem:[%s226_s19 + $0x10] sm:$0xff] %v396_v43 }
 0x131   : > { %v398_v40 = vpop.f32.mrf.mxu3 }
 0x132   : > { %v399_v44 = vadd.f32 %v541_v36, %v398_v40 }
 0x134   : > { %v389_v37 = vpop.f32.mrf.mxu0  ;;  %404 = vst [vmem:[%s226_s19 + $0x18] sm:$0xff] %v399_v44 }
 0x135   : > { %v390_v39 = vadd.f32 %v541_v36, %v389_v37  ;;  %v392_v41 = vpop.f32.mrf.mxu1 }
 0x136   : > { %v393_v42 = vadd.f32 %v541_v36, %v392_v41 }
 0x137   : > { %401 = vst [vmem:[%s226_s19] sm:$0xff] %v390_v39 }
 0x138   : > { %402 = vst [vmem:[%s226_s19 + $0x8] sm:$0xff] %v393_v42 }
 0x139 PF: > { %s15_s18 = sadd.s32 1, %s556_s18  }
 0x13a   : > { %p12_p4 = scmp.ge.s32.totalorder %s15_s18, 4  }
 0x13c   :  { %14 = sbr.rel (!%p12_p4) target bundleno = 1 (0x1), region = 70 }

// kernel: forward.5
= control target key start
LH: loop header
LB: loop body
LE: loop exit
PB: predicated region body
PF: predicated region fallthrough
CT: control target
= control target key end

     0   :  { %v103_v0 = vmov 0   ;;  %v104_v2 = vmov 1   ;;  %s198_s0 = inlined_call_operand.vmem [shape: f32[8,2], index: 0, kind: input, shape index: {}]   ;;  %s199_s2 = inlined_call_operand.vmem [shape: f32[1,128], index: 2, kind: input, shape index: {}]   ;;  %s200_s4 = inlined_call_operand.vmem [shape: f32[1,128], index: 4, kind: input, shape index: {}]   ;;  %s201_s3 = inlined_call_operand.vmem [shape: f32[128,128], index: 3, kind: input, shape index: {}]   ;;  %s202_s1 = inlined_call_operand.vmem [shape: f32[2,128], index: 1, kind: input, shape index: {}]   ;;  %s203_s5 = inlined_call_operand.vmem [shape: f32[8,128], index: 5, kind: output, shape index: {}]  }
   0x1   :  { %97 = vset.pattern.permute.xlu0 %v103_v0  ;;  %v20_v1 = vld [vmem:[%s198_s0] sm:$0xff]  ;;  %v65_v3 = vld [vmem:[%s201_s3 + $0x78] sm:$0xff]  ;;  %v64_v4 = vld [vmem:[%s201_s3 + $0x70] sm:$0xff] }
   0x2   :  { %25 = vperm.xlu0 %97, %v20_v1   ;;  %70 = vmatpush.msra.mxu0 %v65_v3  ;;  %v63_v5 = vld [vmem:[%s201_s3 + $0x68] sm:$0xff]  ;;  %v62_v6 = vld [vmem:[%s201_s3 + $0x60] sm:$0xff]  ;;  %v61_v7 = vld [vmem:[%s201_s3 + $0x58] sm:$0xff] }
   0x3   :  { %v60_v8 = vld [vmem:[%s201_s3 + $0x50] sm:$0xff]  ;;  %v59_v9 = vld [vmem:[%s201_s3 + $0x48] sm:$0xff]  ;;  %v58_v10 = vld [vmem:[%s201_s3 + $0x40] sm:$0xff] }
   0x4   :  { %71 = vmatpush.msra.mxu0 %v64_v4  ;;  %v57_v11 = vld [vmem:[%s201_s3 + $0x38] sm:$0xff]  ;;  %v56_v12 = vld [vmem:[%s201_s3 + $0x30] sm:$0xff]  ;;  %v55_v13 = vld [vmem:[%s201_s3 + $0x28] sm:$0xff] }
   0x5   :  { %v54_v14 = vld [vmem:[%s201_s3 + $0x20] sm:$0xff]  ;;  %v53_v15 = vld [vmem:[%s201_s3 + $0x18] sm:$0xff]  ;;  %v52_v16 = vld [vmem:[%s201_s3 + $0x10] sm:$0xff] }
   0x6   :  { %72 = vmatpush.msra.mxu0 %v63_v5  ;;  %v21_v17 = vld [vmem:[%s202_s1] sm:$0x3]  ;;  %v51_v18 = vld [vmem:[%s201_s3 + $0x8] sm:$0xff] }
   0x7   :  { %v50_v20 = vld [vmem:[%s201_s3] sm:$0xff]  ;;  %v28_v21 = vperm.slane %v21_v17, 0  ;;  %v38_v24 = vperm.slane %v21_v17, 1 }
   0x8   :  { %73 = vmatpush.msra.mxu0 %v62_v6  ;;  %v99_v22 = vld [vmem:[%s199_s2] ss:$0 sm:$0xff] }
   0x9   :  { %v100_v38 = vld [vmem:[%s200_s4] ss:$0 sm:$0xff] }
   0xa   :  { %98 = vset.pattern.permute.xlu0 %v104_v2  ;;  %74 = vmatpush.msra.mxu0 %v61_v7 }
   0xb   :  { %35 = vperm.xlu0 %98, %v20_v1  }
   0xc   :  { %75 = vmatpush.msra.mxu0 %v60_v8 }
   0xe   :  { %76 = vmatpush.msra.mxu0 %v59_v9 }
  0x10   :  { %77 = vmatpush.msra.mxu0 %v58_v10 }
  0x12   :  { %78 = vmatpush.msra.mxu0 %v57_v11 }
  0x14   :  { %79 = vmatpush.msra.mxu0 %v56_v12 }
  0x16   :  { %80 = vmatpush.msra.mxu0 %v55_v13 }
  0x18   :  { %81 = vmatpush.msra.mxu0 %v54_v14 }
  0x1a   :  { %82 = vmatpush.msra.mxu0 %v53_v15 }
  0x1c   :  { %83 = vmatpush.msra.mxu0 %v52_v16 }
  0x1e   :  { %84 = vmatpush.msra.mxu0 %v51_v18 }
  0x20   :  { %85 = vmatpush.msra.mxu0 %v50_v20 }
  0x74   :  { %v26_v19 = vpop.permute.xlu0 %25 }
  0x75   :  { %v29_v23 = vmul.f32 %v28_v21, %v26_v19 }
  0x77   :  { %v33_v26 = vadd.f32 %v99_v22, %v29_v23 }
  0x7d   :  { %v36_v25 = vpop.permute.xlu0 %35 }
  0x7e   :  { %v39_v27 = vmul.f32 %v38_v24, %v36_v25 }
  0x80   :  { %v40_v28 = vadd.f32 %v39_v27, %v33_v26 }
  0x82   :  { %v41_v29 = vmul.f32 %v40_v28, %v40_v28 }
  0x84   :  { %v42_v30 = vmul.f32 %v41_v29, %v40_v28 }
  0x86   :  { %v43_v31 = vmul.f32 0.044715, %v42_v30 }
  0x88   :  { %v44_v32 = vadd.f32 %v43_v31, %v40_v28 }
  0x8a   :  { %v45_v33 = vmul.f32 0.7978846, %v44_v32 }
  0x8c   :  { %101 = vtanh.f32 %v45_v33 }
  0x92   :  { %v102_v34 = vpop.eup %101 }
  0x93   :  { %v47_v35 = vadd.f32 1.0, %v102_v34 }
  0x95   :  { %v48_v36 = vmul.f32 0.5, %v47_v35 }
  0x97   :  { %v49_v37 = vmul.f32 %v48_v36, %v40_v28 }
  0x99   :  { %86 = vmatmul.f32.vlgmr.msra.gmra.mxu0 %v49_v37 }
 0x116   :  { %v87_v39 = vpop.f32.mrf.mxu0 }
 0x117   :  { %v88_v40 = vadd.f32 %v100_v38, %v87_v39 }
 0x119   :  { %90 = vst [vmem:[%s203_s5] sm:$0xff] %v88_v40 }

// kernel: forward.3
= control target key start
LH: loop header
LB: loop body
LE: loop exit
PB: predicated region body
PF: predicated region fallthrough
CT: control target
= control target key end

     0   :  { %s563_s18 = smov 0   ;;  %s647_s0 = inlined_call_operand.vmem [shape: f32[48,4], index: 0, kind: input, shape index: {}]   ;;  %s648_s1 = inlined_call_operand.vmem [shape: f32[4,128], index: 1, kind: input, shape index: {}]   ;;  %s649_s2 = inlined_call_operand.vmem [shape: f32[1,128], index: 2, kind: input, shape index: {}]   ;;  %s650_s3 = inlined_call_operand.vmem [shape: f32[128,128], index: 3, kind: input, shape index: {}]   ;;  %s651_s4 = inlined_call_operand.vmem [shape: f32[1,128], index: 4, kind: input, shape index: {}]   ;;  %s652_s5 = inlined_call_operand.vmem [shape: f32[48,128], index: 5, kind: output, shape index: {}]  }
   0x1 LB: > { %s447_s19 = sadd.s32 4294967295, %s527_s18   ;;  %p451_p0 = scmp.ge.s32.totalorder %s527_s18, 1  ;;  %s527_s18 = sphi %s563_s18, %s15_s18  }
   0x2   : > { %p188_p1 = scmp.lt.s32.totalorder %s527_s18, 3 }
   0x4   : > { %p189_p2 = pnand %p451_p0, %p188_p1 }
   0x5   : > { %s216_s20 = smul.u32 (!%p189_p2), 3, %s447_s19 }
   0x6   : > { %192 = sbr.rel (%p189_p2) target bundleno = 322 (0x142), region = 40 }
   0x7   : > { %p217_p3 = scmp.lt.s32.totalorder (!%p189_p2), %s216_s20, 5 }
   0xb   : > { %v529_v0 = vmov 2   ;;  %v530_v1 = vmov 0   ;;  %s654_s20 = smov (!%p217_p3, %s216_s20), 5  ;;  %v531_v5 = vmov 1   ;;  %v532_v6 = vmov 3   ;;  %v357_v7 = vld [vmem:[%s650_s3 + $0x78] sm:$0xff] }
   0xc   : > { %502 = vset.pattern.permute.xlu1 %v529_v0  ;;  %500 = vset.pattern.permute.xlu0 %v530_v1  ;;  %s452_s21 = sshll.u32 %s654_s20, 3  ;;  %v356_v8 = vld [vmem:[%s650_s3 + $0x70] sm:$0xff]  ;;  %v355_v9 = vld [vmem:[%s650_s3 + $0x68] sm:$0xff]  ;;  %v354_v10 = vld [vmem:[%s650_s3 + $0x60] sm:$0xff] }
   0xd   : > { %504 = vset.pattern.permute.xlu2 %v530_v1  ;;  %s220_s24 = scalar_lea.vmem %s647_s0, %s452_s21  ;;  %457 = vmatpush.msra.mxu2 %v357_v7  ;;  %v353_v11 = vld [vmem:[%s650_s3 + $0x58] sm:$0xff]  ;;  %v352_v12 = vld [vmem:[%s650_s3 + $0x50] sm:$0xff]  ;;  %v351_v14 = vld [vmem:[%s650_s3 + $0x48] sm:$0xff]  ;;  %s226_s19 = scalar_lea.vmem %s652_s5, %s452_s21 }
   0xe   : > { %v230_v2 = vld [vmem:[%s220_s24 + $0x10] sm:$0xff]  ;;  %v229_v3 = vld [vmem:[%s220_s24 + $0x8] sm:$0xff]  ;;  %v228_v4 = vld [vmem:[%s220_s24] sm:$0xff]  ;;  %362 = vmatpush.msra.mxu0 %v357_v7  ;;  %456 = vmatpush.msra.mxu1 %v357_v7 }
   0xf   : > { %286 = vperm.xlu1 %502, %v230_v2   ;;  %245 = vperm.xlu0 %500, %v230_v2   ;;  %v350_v15 = vld [vmem:[%s650_s3 + $0x40] sm:$0xff]  ;;  %v349_v16 = vld [vmem:[%s650_s3 + $0x38] sm:$0xff]  ;;  %v348_v17 = vld [vmem:[%s650_s3 + $0x30] sm:$0xff] }
  0x10   : > { %240 = vperm.xlu2 %504, %v229_v3   ;;  %459 = vmatpush.msra.mxu2 %v356_v8  ;;  %v347_v18 = vld [vmem:[%s650_s3 + $0x28] sm:$0xff]  ;;  %v346_v20 = vld [vmem:[%s650_s3 + $0x20] sm:$0xff]  ;;  %v345_v22 = vld [vmem:[%s650_s3 + $0x18] sm:$0xff] }
  0x11   : > { %363 = vmatpush.msra.mxu0 %v356_v8  ;;  %458 = vmatpush.msra.mxu1 %v356_v8  ;;  %v231_v21 = vld [vmem:[%s648_s1] sm:$0xf]  ;;  %v344_v26 = vld [vmem:[%s650_s3 + $0x10] sm:$0xff]  ;;  %v343_v29 = vld [vmem:[%s650_s3 + $0x8] sm:$0xff] }
  0x12   : > { %461 = vmatpush.msra.mxu2 %v355_v9  ;;  %v248_v23 = vperm.slane %v231_v21, 0  ;;  %v513_v27 = vld [vmem:[%s649_s2] ss:$0 sm:$0xff]  ;;  %v270_v30 = vperm.slane %v231_v21, 1  ;;  %v289_v32 = vperm.slane %v231_v21, 2  ;;  %v308_v34 = vperm.slane %v231_v21, 3 }
  0x13   : > { %364 = vmatpush.msra.mxu0 %v355_v9  ;;  %460 = vmatpush.msra.mxu1 %v355_v9  ;;  %v342_v31 = vld [vmem:[%s650_s3] sm:$0xff] }
  0x14   : > { %463 = vmatpush.msra.mxu2 %v354_v10 }
  0x15   : > { %365 = vmatpush.msra.mxu0 %v354_v10  ;;  %462 = vmatpush.msra.mxu1 %v354_v10 }
  0x16   : > { %465 = vmatpush.msra.mxu2 %v353_v11 }
  0x17   : > { %503 = vset.pattern.permute.xlu1 %v530_v1  ;;  %501 = vset.pattern.permute.xlu0 %v531_v5 }
  0x18   : > { %267 = vperm.xlu0 %501, %v230_v2   ;;  %235 = vperm.xlu1 %503, %v228_v4  }
  0x19   : > { %505 = vset.pattern.permute.xlu2 %v532_v6  ;;  %366 = vmatpush.msra.mxu0 %v353_v11 }
  0x1a   : > { %305 = vperm.xlu2 %505, %v230_v2   ;;  %464 = vmatpush.msra.mxu1 %v353_v11 }
  0x1b   : > { %467 = vmatpush.msra.mxu2 %v352_v12  ;;  %367 = vmatpush.msra.mxu0 %v352_v12 }
  0x1c   : > { %466 = vmatpush.msra.mxu1 %v352_v12 }
  0x1d   : > { %469 = vmatpush.msra.mxu2 %v351_v14  ;;  %368 = vmatpush.msra.mxu0 %v351_v14 }
  0x1e   : > { %468 = vmatpush.msra.mxu1 %v351_v14 }
  0x1f   : > { %471 = vmatpush.msra.mxu2 %v350_v15  ;;  %369 = vmatpush.msra.mxu0 %v350_v15 }
  0x20   : > { %506 = vset.pattern.permute.xlu1 %v531_v5  ;;  %508 = vset.pattern.permute.xlu0 %v529_v0 }
  0x21   : > { %259 = vperm.xlu1 %506, %v228_v4   ;;  %278 = vperm.xlu0 %508, %v228_v4  }
  0x22   : > { %507 = vset.pattern.permute.xlu2 %v531_v5  ;;  %470 = vmatpush.msra.mxu1 %v350_v15 }
  0x23   : > { %263 = vperm.xlu2 %507, %v229_v3   ;;  %473 = vmatpush.msra.mxu2 %v349_v16 }
  0x24   : > { %370 = vmatpush.msra.mxu0 %v349_v16  ;;  %472 = vmatpush.msra.mxu1 %v349_v16 }
  0x25   : > { %475 = vmatpush.msra.mxu2 %v348_v17 }
  0x26   : > { %371 = vmatpush.msra.mxu0 %v348_v17  ;;  %474 = vmatpush.msra.mxu1 %v348_v17 }
  0x27   : > { %477 = vmatpush.msra.mxu2 %v347_v18 }
  0x28   : > { %372 = vmatpush.msra.mxu0 %v347_v18  ;;  %476 = vmatpush.msra.mxu1 %v347_v18 }
  0x29   : > { %509 = vset.pattern.permute.xlu1 %v529_v0  ;;  %512 = vset.pattern.permute.xlu0 %v532_v6 }
  0x2a   : > { %282 = vperm.xlu1 %509, %v229_v3   ;;  %479 = vmatpush.msra.mxu2 %v346_v20 }
  0x2b   : > { %510 = vset.pattern.permute.xlu2 %v532_v6  ;;  %373 = vmatpush.msra.mxu0 %v346_v20 }
  0x2c   : > { %297 = vperm.xlu2 %510, %v228_v4   ;;  %478 = vmatpush.msra.mxu1 %v346_v20 }
  0x2d   : > { %481 = vmatpush.msra.mxu2 %v345_v22  ;;  %374 = vmatpush.msra.mxu0 %v345_v22 }
  0x2e   : > { %480 = vmatpush.msra.mxu1 %v345_v22 }
  0x2f   : > { %483 = vmatpush.msra.mxu2 %v344_v26  ;;  %375 = vmatpush.msra.mxu0 %v344_v26 }
  0x30   : > { %482 = vmatpush.msra.mxu1 %v344_v26 }
  0x31   : > { %485 = vmatpush.msra.mxu2 %v343_v29  ;;  %376 = vmatpush.msra.mxu0 %v343_v29 }
  0x32   : > { %511 = vset.pattern.permute.xlu1 %v532_v6  ;;  %484 = vmatpush.msra.mxu1 %v343_v29 }
  0x33   : > { %301 = vperm.xlu1 %511, %v229_v3   ;;  %487 = vmatpush.msra.mxu2 %v342_v31 }
  0x34   : > { %377 = vmatpush.msra.mxu0 %v342_v31  ;;  %486 = vmatpush.msra.mxu1 %v342_v31 }
  0x6a   : > { %v597_v13 = vpop.permute.xlu2 %240 }
  0x6b   : > { %v250_v60 = vmul.f32 %v248_v23, %v597_v13 }
  0x6d   : > { %v256_v0 = vadd.f32 %v513_v27, %v250_v60 }
  0x74   : > { %v306_v19 = vpop.permute.xlu2 %305 }
  0x75   : > { %v311_v40 = vmul.f32 %v308_v34, %v306_v19 }
  0x7d   : > { %v264_v35 = vpop.permute.xlu2 %263 }
  0x7e   : > { %v272_v1 = vmul.f32 %v270_v30, %v264_v35 }
  0x80   : > { %v275_v6 = vadd.f32 %v272_v1, %v256_v0 }
  0x81   : > { %v287_v24 = vpop.permute.xlu1 %286  ;;  %v246_v25 = vpop.permute.xlu0 %245 }
  0x82   : > { %v251_v28 = vmul.f32 %v248_v23, %v246_v25  ;;  %v292_v39 = vmul.f32 %v289_v32, %v287_v24 }
  0x84   : > { %v257_v33 = vadd.f32 %v513_v27, %v251_v28  ;;  %v514_v28 = vld [vmem:[%s651_s4] ss:$0 sm:$0xff] }
  0x86   : > { %v298_v45 = vpop.permute.xlu2 %297 }
  0x87   : > { %v309_v54 = vmul.f32 %v308_v34, %v298_v45 }
  0x8a   : > { %v268_v36 = vpop.permute.xlu0 %267  ;;  %v236_v37 = vpop.permute.xlu1 %235 }
  0x8b   : > { %v273_v38 = vmul.f32 %v270_v30, %v268_v36  ;;  %v249_v43 = vmul.f32 %v248_v23, %v236_v37 }
  0x8d   : > { %v276_v41 = vadd.f32 %v273_v38, %v257_v33  ;;  %v255_v49 = vadd.f32 %v513_v27, %v249_v43 }
  0x8f   : > { %v295_v42 = vadd.f32 %v292_v39, %v276_v41 }
  0x91   : > { %v314_v44 = vadd.f32 %v311_v40, %v295_v42 }
  0x93   : > { %v260_v46 = vpop.permute.xlu1 %259  ;;  %v279_v47 = vpop.permute.xlu0 %278  ;;  %v317_v48 = vmul.f32 %v314_v44, %v314_v44 }
  0x94   : > { %v271_v50 = vmul.f32 %v270_v30, %v260_v46  ;;  %v290_v51 = vmul.f32 %v289_v32, %v279_v47 }
  0x95   : > { %v320_v52 = vmul.f32 %v317_v48, %v314_v44 }
  0x96   : > { %v274_v53 = vadd.f32 %v271_v50, %v255_v49 }
  0x97   : > { %v323_v55 = vmul.f32 0.044715, %v320_v52 }
  0x98   : > { %v293_v56 = vadd.f32 %v290_v51, %v274_v53 }
  0x99   : > { %v326_v57 = vadd.f32 %v323_v55, %v314_v44 }
  0x9a   : > { %v312_v58 = vadd.f32 %v309_v54, %v293_v56 }
  0x9b   : > { %v329_v59 = vmul.f32 0.7978846, %v326_v57 }
  0x9c   : > { %v315_v61 = vmul.f32 %v312_v58, %v312_v58  ;;  %v283_v62 = vpop.permute.xlu1 %282 }
  0x9d   : > { %515 = vtanh.f32 %v329_v59  ;;  %v291_v3 = vmul.f32 %v289_v32, %v283_v62 }
  0x9e   : > { %v318_v63 = vmul.f32 %v315_v61, %v312_v58 }
  0x9f   : > { %v294_v10 = vadd.f32 %v291_v3, %v275_v6 }
  0xa0   : > { %v321_v2 = vmul.f32 0.044715, %v318_v63 }
  0xa2   : > { %v324_v4 = vadd.f32 %v321_v2, %v312_v58 }
  0xa3   : > { %v516_v5 = vpop.eup %515 }
  0xa4   : > { %v335_v7 = vadd.f32 1.0, %v516_v5  ;;  %v327_v8 = vmul.f32 0.7978846, %v324_v4 }
  0xa5   : > { %v302_v9 = vpop.permute.xlu1 %301 }
  0xa6   : > { %v310_v11 = vmul.f32 %v308_v34, %v302_v9  ;;  %v338_v12 = vmul.f32 0.5, %v335_v7  ;;  %517 = vtanh.f32 %v327_v8 }
  0xa8   : > { %v313_v14 = vadd.f32 %v310_v11, %v294_v10  ;;  %v341_v13 = vmul.f32 %v338_v12, %v314_v44 }
  0xaa   : > { %v316_v15 = vmul.f32 %v313_v14, %v313_v14  ;;  %384 = vmatmul.f32.vlgmr.msra.gmra.mxu2 %v341_v13 }
  0xac   : > { %v518_v16 = vpop.eup %517  ;;  %v319_v17 = vmul.f32 %v316_v15, %v313_v14 }
  0xad   : > { %v333_v18 = vadd.f32 1.0, %v518_v16 }
  0xae   : > { %v322_v19 = vmul.f32 0.044715, %v319_v17 }
  0xaf   : > { %v336_v20 = vmul.f32 0.5, %v333_v18 }
  0xb0   : > { %v325_v21 = vadd.f32 %v322_v19, %v313_v14 }
  0xb1   : > { %v339_v22 = vmul.f32 %v336_v20, %v312_v58 }
  0xb2   : > { %v328_v23 = vmul.f32 0.7978846, %v325_v21 }
  0xb3   : > { %378 = vmatmul.f32.vlgmr.msra.gmra.mxu0 %v339_v22 }
  0xb4   : > { %519 = vtanh.f32 %v328_v23 }
  0xba   : > { %v520_v24 = vpop.eup %519 }
  0xbb   : > { %v334_v25 = vadd.f32 1.0, %v520_v24 }
  0xbd   : > { %v337_v26 = vmul.f32 0.5, %v334_v25 }
  0xbf   : > { %v340_v27 = vmul.f32 %v337_v26, %v313_v14 }
  0xc1   : > { %381 = vmatmul.f32.vlgmr.msra.gmra.mxu1 %v340_v27 }
 0x12d   : > { %v385_v29 = vpop.f32.mrf.mxu2 }
 0x12e   : > { %v386_v30 = vadd.f32 %v514_v28, %v385_v29 }
 0x130   : > { %390 = vst [vmem:[%s226_s19 + $0x10] sm:$0xff] %v386_v30  ;;  %v379_v31 = vpop.f32.mrf.mxu0 }
 0x131   : > { %v380_v32 = vadd.f32 %v514_v28, %v379_v31 }
 0x133   : > { %388 = vst [vmem:[%s226_s19] sm:$0xff] %v380_v32 }
 0x13e   : > { %v382_v33 = vpop.f32.mrf.mxu1 }
 0x13f   : > { %v383_v34 = vadd.f32 %v514_v28, %v382_v33 }
 0x141   : > { %389 = vst [vmem:[%s226_s19 + $0x8] sm:$0xff] %v383_v34 }
 0x142 PF: > { %s15_s18 = sadd.s32 1, %s527_s18  }
 0x143   : > { %p12_p4 = scmp.ge.s32.totalorder %s15_s18, 4  }
 0x145   :  { %14 = sbr.rel (!%p12_p4) target bundleno = 1 (0x1), region = 70 }

</bundles_post_ra>
